<compile_context>
chip_gen: v5e
topology: v5e:2x2
jax: 0.10.0
libtpu: 0.0.40
codegen_flags: <defaults>
</compile_context>

<pallas_src>
import functools

import jax
import jax.numpy as jnp
from jax import lax
from jax.experimental import pallas as pl
from jax.experimental.pallas import tpu as pltpu


def _focal_loss_kernel(x_ref, t_ref, out_ref, *, gamma, num_classes, hw,
                       s_tile, needs_mask):
    """One grid step: a (C, S_TILE, 128) slab of logits for one batch element.

    x_ref  : (1, C, S_TILE, 128) float logits
    t_ref  : (1, S_TILE, 128)    int32 class indices
    out_ref: (1, 1, 128)         float32 per-batch lane partial sums (accumulator)
    """
    j = pl.program_id(1)

    x = x_ref[0].astype(jnp.float32)          # (C, S, 128)
    t = t_ref[0]                              # (S, 128) int32

    # Numerically-stable log-sum-exp over the class axis.  The class axis is a
    # leading (non-layout) axis, so these reductions are plain VPU elementwise
    # ops across C slabs -- no cross-lane XLU work.
    x_max = jnp.max(x, axis=0)                # (S, 128)
    exp_sh = jnp.exp(x - x_max[None, :, :])   # (C, S, 128)  EUP
    sum_exp = jnp.sum(exp_sh, axis=0)         # (S, 128)

    # Target-class logit via unrolled per-class select (no dynamic gather on TPU).
    x_t = jnp.zeros_like(x_max)               # (S, 128)
    for cls in range(num_classes):
        x_t = jnp.where(t == cls, x[cls], x_t)

    ce = jnp.log(sum_exp) + x_max - x_t       # (S, 128) per-pixel cross entropy
    pt = jnp.exp(-ce)
    w = jnp.maximum(1.0 - pt, 0.0)            # clamp: avoids NaN if ce rounds < 0

    g_int = int(gamma)
    if float(g_int) == float(gamma) and 0 <= g_int <= 16:
        # Integer gamma (the default 2.0): repeated multiply, no pow/exp/log.
        if g_int == 0:
            wg = jnp.ones_like(w)
        else:
            wg = w
            for _ in range(g_int - 1):
                wg = wg * w
    else:
        wg = w ** float(gamma)

    focal = wg * ce                           # (S, 128)

    if needs_mask:
        # Mask pixels past the true H*W (ragged last tile / lane padding),
        # computed in-kernel -- no mask stream read from HBM.
        s_id = lax.broadcasted_iota(jnp.int32, (s_tile, 128), 0)
        l_id = lax.broadcasted_iota(jnp.int32, (s_tile, 128), 1)
        pix = (j * s_tile + s_id) * 128 + l_id
        focal = jnp.where(pix < hw, focal, 0.0)

    # Per-lane partial sums; the full scalar reduce happens once in the wrapper.
    partial = jnp.sum(focal, axis=0, keepdims=True)   # (1, 128)

    @pl.when(j == 0)
    def _():
        out_ref[...] = jnp.zeros_like(out_ref)

    out_ref[...] += partial.reshape(1, 1, 128)


def _pick_pixel_tile(p, c, itemsize, target_bytes=1 << 20):
    """Rows of 128 pixels per grid step, targeting ~1 MiB of logits per block."""
    s = target_bytes // max(1, c * 128 * itemsize)
    s = max(8, (s // 8) * 8)
    return p if p <= s else s


def focal_loss(logits_nchw, target_nhw, gamma=2.0):
    """Focal loss matching the PyTorch module (weight=None, mean reduction)."""
    n, c, h, w = logits_nchw.shape
    hw = h * w
    m = n * hw

    # Free views of the NCHW input: (N, C, HW) and (N, HW).  Only if HW is not
    # a multiple of 128 do we pad the pixel axis (rare for segmentation shapes).
    x = logits_nchw.reshape(n, c, hw)
    t = target_nhw.reshape(n, hw).astype(jnp.int32)
    hw_pad = ((hw + 127) // 128) * 128
    if hw_pad != hw:
        x = jnp.pad(x, ((0, 0), (0, 0), (0, hw_pad - hw)))
        t = jnp.pad(t, ((0, 0), (0, hw_pad - hw)))
    p = hw_pad // 128

    # Pixels mapped to (sublane, lane): (N, C, P, 128) / (N, P, 128) views.
    x4 = x.reshape(n, c, p, 128)
    t3 = t.reshape(n, p, 128)

    s_tile = _pick_pixel_tile(p, c, x4.dtype.itemsize)
    n_tiles = pl.cdiv(p, s_tile)
    needs_mask = (hw_pad != hw) or (p % s_tile != 0)

    kernel = functools.partial(
        _focal_loss_kernel,
        gamma=float(gamma),
        num_classes=c,
        hw=hw,
        s_tile=s_tile,
        needs_mask=needs_mask,
    )

    partials = pl.pallas_call(
        kernel,
        out_shape=jax.ShapeDtypeStruct((n, 1, 128), jnp.float32),
        grid_spec=pltpu.PrefetchScalarGridSpec(
            num_scalar_prefetch=0,
            grid=(n, n_tiles),
            in_specs=[
                pl.BlockSpec((1, c, s_tile, 128), lambda i, j: (i, 0, j, 0)),
                pl.BlockSpec((1, s_tile, 128), lambda i, j: (i, j, 0)),
            ],
            out_specs=pl.BlockSpec((1, 1, 128), lambda i, j: (i, 0, 0)),
        ),
        compiler_params=pltpu.CompilerParams(
            dimension_semantics=("parallel", "arbitrary")),
    )(x4, t3)

    return (jnp.sum(partials) / m).astype(jnp.float32)


def focal_loss_ref(logits_nchw, target_nhw, gamma=2.0):
    """Pure-JAX reference mirroring F.cross_entropy + focal weighting."""
    n, c, h, w = logits_nchw.shape
    x = jnp.transpose(logits_nchw, (0, 2, 3, 1)).reshape(-1, c).astype(jnp.float32)
    t = target_nhw.reshape(-1)
    logp = jax.nn.log_softmax(x, axis=-1)
    ce = -jnp.take_along_axis(logp, t[:, None], axis=-1)[:, 0]
    pt = jnp.exp(-ce)
    return jnp.mean((1.0 - pt) ** gamma * ce)


if __name__ == "__main__":
    # Deterministic small inputs: segmentation-style logits (N, C, H, W).
    key = jax.random.PRNGKey(0)
    kx, kt = jax.random.split(key)
    N, C, H, W = 2, 4, 16, 16
    x = jax.random.normal(kx, (N, C, H, W), dtype=jnp.float32)
    target = jax.random.randint(kt, (N, H, W), 0, C, dtype=jnp.int32)

    out = focal_loss(x, target, gamma=2.0)
    out = jax.block_until_ready(out)

    ref = focal_loss_ref(x, target, gamma=2.0)
    assert jnp.allclose(out, ref, rtol=1e-5, atol=1e-5), (out, ref)

    print("KERNEL_OK")
</pallas_src>

<mosaic_0001>
module attributes {stable_mosaic.version = 11 : i64} {
  func.func @_focal_loss_kernel(%arg0: i32, %arg1: i32, %arg2: memref<1x4x2x128xf32, #tpu.memory_space<vmem>>, %arg3: memref<1x2x128xi32, #tpu.memory_space<vmem>>, %arg4: memref<1x1x128xf32, #tpu.memory_space<vmem>>) attributes {dimension_semantics = [#tpu.dimension_semantics<parallel>, #tpu.dimension_semantics<arbitrary>], iteration_bounds = array<i64: 2, 1>, scalar_prefetch = 0 : i64, scratch_operands = 0 : i64, tpu.core_type = #tpu.core_type<tc>, window_params = [{transform_indices = @transform_0, window_bounds = array<i64: 1, 4, 2, 128>}, {transform_indices = @transform_1, window_bounds = array<i64: 1, 2, 128>}, {transform_indices = @transform_2, window_bounds = array<i64: 1, 1, 128>}]} {
    %c0 = arith.constant 0 : index
    %c0_0 = arith.constant 0 : index
    %c0_1 = arith.constant 0 : index
    %c0_2 = arith.constant 0 : index
    %0 = vector.load %arg2[%c0, %c0_0, %c0_1, %c0_2] : memref<1x4x2x128xf32, #tpu.memory_space<vmem>>, vector<1x4x2x128xf32>
    %1 = vector.shape_cast %0 : vector<1x4x2x128xf32> to vector<4x2x128xf32>
    %c0_3 = arith.constant 0 : index
    %c0_4 = arith.constant 0 : index
    %c0_5 = arith.constant 0 : index
    %2 = vector.load %arg3[%c0_3, %c0_4, %c0_5] : memref<1x2x128xi32, #tpu.memory_space<vmem>>, vector<1x2x128xi32>
    %3 = vector.shape_cast %2 : vector<1x2x128xi32> to vector<2x128xi32>
    %cst = arith.constant dense<0xFF800000> : vector<2x128xf32>
    %4 = vector.multi_reduction <maximumf>, %1, %cst [0] : vector<4x2x128xf32> to vector<2x128xf32>
    %5 = vector.shape_cast %4 : vector<2x128xf32> to vector<1x2x128xf32>
    %6 = vector.broadcast %5 : vector<1x2x128xf32> to vector<4x2x128xf32>
    %7 = arith.subf %1, %6 : vector<4x2x128xf32>
    %8 = math.exp %7 : vector<4x2x128xf32>
    %cst_6 = arith.constant dense<0.000000e+00> : vector<2x128xf32>
    %9 = vector.multi_reduction <add>, %8, %cst_6 [0] : vector<4x2x128xf32> to vector<2x128xf32>
    %cst_7 = arith.constant 0.000000e+00 : f32
    %10 = vector.broadcast %cst_7 : f32 to vector<2x128xf32>
    %c0_i32 = arith.constant 0 : i32
    %11 = vector.broadcast %c0_i32 : i32 to vector<2x128xi32>
    %12 = arith.cmpi eq, %3, %11 : vector<2x128xi32>
    %13 = vector.extract_strided_slice %1 {offsets = [0, 0, 0], sizes = [1, 2, 128], strides = [1, 1, 1]} : vector<4x2x128xf32> to vector<1x2x128xf32>
    %14 = vector.shape_cast %13 : vector<1x2x128xf32> to vector<2x128xf32>
    %15 = arith.select %12, %14, %10 : vector<2x128xi1>, vector<2x128xf32>
    %c1_i32 = arith.constant 1 : i32
    %16 = vector.broadcast %c1_i32 : i32 to vector<2x128xi32>
    %17 = arith.cmpi eq, %3, %16 : vector<2x128xi32>
    %18 = vector.extract_strided_slice %1 {offsets = [1, 0, 0], sizes = [1, 2, 128], strides = [1, 1, 1]} : vector<4x2x128xf32> to vector<1x2x128xf32>
    %19 = vector.shape_cast %18 : vector<1x2x128xf32> to vector<2x128xf32>
    %20 = arith.select %17, %19, %15 : vector<2x128xi1>, vector<2x128xf32>
    %c2_i32 = arith.constant 2 : i32
    %21 = vector.broadcast %c2_i32 : i32 to vector<2x128xi32>
    %22 = arith.cmpi eq, %3, %21 : vector<2x128xi32>
    %23 = vector.extract_strided_slice %1 {offsets = [2, 0, 0], sizes = [1, 2, 128], strides = [1, 1, 1]} : vector<4x2x128xf32> to vector<1x2x128xf32>
    %24 = vector.shape_cast %23 : vector<1x2x128xf32> to vector<2x128xf32>
    %25 = arith.select %22, %24, %20 : vector<2x128xi1>, vector<2x128xf32>
    %c3_i32 = arith.constant 3 : i32
    %26 = vector.broadcast %c3_i32 : i32 to vector<2x128xi32>
    %27 = arith.cmpi eq, %3, %26 : vector<2x128xi32>
    %28 = vector.extract_strided_slice %1 {offsets = [3, 0, 0], sizes = [1, 2, 128], strides = [1, 1, 1]} : vector<4x2x128xf32> to vector<1x2x128xf32>
    %29 = vector.shape_cast %28 : vector<1x2x128xf32> to vector<2x128xf32>
    %30 = arith.select %27, %29, %25 : vector<2x128xi1>, vector<2x128xf32>
    %31 = math.log %9 : vector<2x128xf32>
    %32 = arith.addf %31, %4 : vector<2x128xf32>
    %33 = arith.subf %32, %30 : vector<2x128xf32>
    %cst_8 = arith.constant 0.000000e+00 : f32
    %34 = vector.broadcast %cst_8 : f32 to vector<2x128xf32>
    %35 = arith.subf %34, %33 : vector<2x128xf32>
    %36 = math.exp %35 : vector<2x128xf32>
    %cst_9 = arith.constant 1.000000e+00 : f32
    %37 = vector.broadcast %cst_9 : f32 to vector<2x128xf32>
    %38 = arith.subf %37, %36 : vector<2x128xf32>
    %cst_10 = arith.constant 0.000000e+00 : f32
    %39 = vector.broadcast %cst_10 : f32 to vector<2x128xf32>
    %40 = arith.maximumf %38, %39 : vector<2x128xf32>
    %41 = arith.mulf %40, %40 : vector<2x128xf32>
    %42 = arith.mulf %41, %33 : vector<2x128xf32>
    %cst_11 = arith.constant dense<0.000000e+00> : vector<128xf32>
    %43 = vector.multi_reduction <add>, %42, %cst_11 [0] : vector<2x128xf32> to vector<128xf32>
    %44 = vector.shape_cast %43 : vector<128xf32> to vector<1x128xf32>
    %c0_i32_12 = arith.constant 0 : i32
    %45 = arith.cmpi eq, %arg1, %c0_i32_12 : i32
    %46 = arith.extui %45 : i1 to i32
    %c0_i32_13 = arith.constant 0 : i32
    %47 = arith.cmpi ne, %46, %c0_i32_13 : i32
    scf.if %47 {
      %cst_20 = arith.constant 0.000000e+00 : f32
      %52 = vector.broadcast %cst_20 : f32 to vector<1x1x128xf32>
      %c0_21 = arith.constant 0 : index
      %c0_22 = arith.constant 0 : index
      %c0_23 = arith.constant 0 : index
      %53 = vector.load %arg4[%c0_21, %c0_22, %c0_23] : memref<1x1x128xf32, #tpu.memory_space<vmem>>, vector<1x1x128xf32>
      tpu.vector_store %arg4[%c0_21, %c0_22, %c0_23], %52 {strides = array<i32>} : memref<1x1x128xf32, #tpu.memory_space<vmem>>, vector<1x1x128xf32>,
    } else {
    }
    %c0_14 = arith.constant 0 : index
    %c0_15 = arith.constant 0 : index
    %c0_16 = arith.constant 0 : index
    %48 = vector.load %arg4[%c0_14, %c0_15, %c0_16] : memref<1x1x128xf32, #tpu.memory_space<vmem>>, vector<1x1x128xf32>
    %49 = vector.shape_cast %44 : vector<1x128xf32> to vector<1x1x128xf32>
    %50 = arith.addf %48, %49 : vector<1x1x128xf32>
    %c0_17 = arith.constant 0 : index
    %c0_18 = arith.constant 0 : index
    %c0_19 = arith.constant 0 : index
    %51 = vector.load %arg4[%c0_17, %c0_18, %c0_19] : memref<1x1x128xf32, #tpu.memory_space<vmem>>, vector<1x1x128xf32>
    tpu.vector_store %arg4[%c0_17, %c0_18, %c0_19], %50 {strides = array<i32>} : memref<1x1x128xf32, #tpu.memory_space<vmem>>, vector<1x1x128xf32>,
    return
  }
  func.func @transform_0(%arg0: i32, %arg1: i32) -> (i32, i32, i32, i32) {
    %c0_i32 = arith.constant 0 : i32
    %c0_i32_0 = arith.constant 0 : i32
    %c0_i32_1 = arith.constant 0 : i32
    return %arg0, %c0_i32, %arg1, %c0_i32_0 : i32, i32, i32, i32
  }
  func.func @transform_1(%arg0: i32, %arg1: i32) -> (i32, i32, i32) {
    %c0_i32 = arith.constant 0 : i32
    %c0_i32_0 = arith.constant 0 : i32
    return %arg0, %arg1, %c0_i32 : i32, i32, i32
  }
  func.func @transform_2(%arg0: i32, %arg1: i32) -> (i32, i32, i32) {
    %c0_i32 = arith.constant 0 : i32
    %c0_i32_0 = arith.constant 0 : i32
    %c0_i32_1 = arith.constant 0 : i32
    return %arg0, %c0_i32, %c0_i32_0 : i32, i32, i32
  }
}

</mosaic_0001>

<bundles_post_ra>
// kernel: tpu_custom_call.1
= control target key start
LH: loop header
LB: loop body
LE: loop exit
PB: predicated region body
PF: predicated region fallthrough
CT: control target
= control target key end

     0   :  { %7 = vsyncpa [#allocation3], 0  ;;  %s819_s0 = inlined_call_operand.hbm [shape: f32[2,4,2,128], index: 0, kind: input, shape index: {}]   ;;  %s820_s1 = inlined_call_operand.hbm [shape: s32[2,2,128], index: 1, kind: input, shape index: {}]   ;;  %s821_s2 = inlined_call_operand.hbm [shape: f32[2,1,128], index: 2, kind: output, shape index: {}]  }
   0x1   :  { %9 = vsyncpa [#allocation3 + $0x1], 0 }
   0x2   :  { %10 = vsyncpa [#allocation6], 0 }
   0x3   :  { %12 = vsyncpa [#allocation6 + $0x1], 0 }
   0x4   :  { %13 = vsyncpa [#allocation4], 0 }
   0x5   :  { %15 = vsyncpa [#allocation4 + $0x1], 0  ;;  %s662_s9 = smov 0   ;;  %s664_s10 = smov 0  }
   0x6   :  { %s666_s11 = smov 0   ;;  %s668_s12 = smov 0  }
   0x7   :  { %s670_s13 = smov 0   ;;  %s672_s14 = smov 0  }
   0x8 LB: > { %s399_s15 = sadd.s32 4294967295, %s642_s14   ;;  %s400_s16 = sadd.s32 4294967294, %s642_s14   ;;  %s642_s14 = sphi %s672_s14, %s21_s14   ;;  %s638_s13 = sphi %s670_s13, %s831_s13   ;;  %s634_s12 = sphi %s668_s12, %s830_s12   ;;  %s630_s11 = sphi %s666_s11, %s829_s11   ;;  %s626_s10 = sphi %s664_s10, %s828_s10   ;;  %s622_s9 = sphi %s662_s9, %s827_s9  }
   0x9   : > { %s33_s17 = sadd.s32 1, %s638_s13  ;;  %s42_s18 = sadd.s32 1, %s630_s11 }
   0xa   : > { %p35_p0 = scmp.ge.s32.totalorder %s33_s17, 2  ;;  %p49_p1 = scmp.ne.s32.totalorder %s630_s11, %s626_s10 }
   0xb   : > { %p50_p2 = scmp.eq.s32.totalorder %s642_s14, 0  ;;  %p55_p3 = scmp.ne.s32.totalorder %s626_s10, %s622_s9 }
   0xc   : > { %s833_s17 = smov (%p35_p0, %s33_s17), 0  ;;  %p56_p5 = scmp.eq.s32.totalorder %s399_s15, 0 }
   0xd   : > { %p703_p4 = por %p50_p2, %p49_p1  ;;  %s37_s20 = ssub.s32 %s638_s13, %s833_s17 }
   0xe   : > { %p107_p6 = scmp.eq.s32.totalorder %s399_s15, 1  ;;  %p40_p7 = scmp.eq.s32.totalorder %s37_s20, 0 }
   0xf   : > { %p709_p8 = por %p56_p5, %p55_p3  ;;  %p113_p10 = scmp.eq.s32.totalorder %s400_s16, 1 }
  0x10   : > { %p713_p9 = por %p107_p6, %p49_p1  ;;  %p402_p12 = scmp.ge.s32.totalorder %s642_s14, 2 }
  0x11   : > { %s718_s23 = scalar_select %p40_p7, %s630_s11, %s42_s18  }
  0x12   : > { %p720_p11 = por %p113_p10, %p55_p3  ;;  %p431_p13 = scmp.lt.s32.totalorder %s642_s14, 2 }
  0x13   : > { %s133_s25 = sand.u32 1, %s630_s11   ;;  %s413_s27 = sshll.u32 %s638_s13, 3 }
  0x14   : > { %s403_s26 = sshll.u32 %s133_s25, 3  ;;  %s143_s30 = scalar_lea.hbm %s819_s0, %s413_s27 }
  0x15   : > { %s137_s3 = scalar_lea.vmem [#allocation2], %s403_s26  ;;  %s144_s5 = sshll.u32 %s143_s30, 4  ;;  %s145_s5 = int_to_ptr.hbm [resolvable:$true] %s144_s5 }
  0x16   : > { %s146_s4 = sshll.u32 %s137_s3, 4  ;;  %p733_p0 = pnand %p431_p13, %p703_p4  ;;  %s147_s4 = int_to_ptr.vmem [resolvable:$true] %s146_s4 }
  0x17   : > { %p408_p1 = scmp.ge.s32.totalorder %s642_s14, 1  ;;  %s134_s7 = scalar_lea.sflag [#allocation3], %s133_s25 }
  0x18   : > { %s644_s8 = smov 32   ;;  %s645_s15 = smov 2  }
  0x19   : > { %423 = dma.hbm_to_vmem [thread:$0]  (!%p733_p0), %s145_s5, 128, %s147_s4, %s134_s7, %s644_s8, %s644_s8, %s645_s15  }
  0x1a   : > { %p174_p2 = scmp.lt.s32.totalorder %s642_s14, 3  ;;  %s406_s16 = sshll.u32 %s133_s25, 1 }
  0x1b   : > { %s407_s18 = sshll.u32 %s638_s13, 1  ;;  %s160_s27 = scalar_lea.vmem [#allocation5], %s406_s16 }
  0x1c   : > { %p175_p3 = pnand %p408_p1, %p174_p2  ;;  %s165_s19 = scalar_lea.hbm %s820_s1, %s407_s18 }
  0x1d   : > { %s169_s28 = sshll.u32 %s160_s27, 4  ;;  %s167_s29 = sshll.u32 %s165_s19, 4  ;;  %s170_s28 = int_to_ptr.vmem [resolvable:$true] %s169_s28  ;;  %s168_s29 = int_to_ptr.hbm [resolvable:$true] %s167_s29 }
  0x1e   : > { %s157_s30 = scalar_lea.sflag [#allocation6], %s133_s25  ;;  %178 = sbr.rel (%p175_p3) target bundleno = 116 (0x74), region = 28 }
  0x1f   : > { %426 = dma.hbm_to_vmem [thread:$0]  (!%p733_p0), %s168_s29, 32, %s170_s28, %s157_s30  }
  0x20   : > { %s748_s3 = sand.u32 (!%p175_p3), 1, %s626_s10  }
  0x21   : > { %s409_s4 = sshll.u32 (!%p175_p3), %s748_s3, 3  ;;  %s181_s5 = scalar_lea.sflag (!%p175_p3), [#allocation3], %s748_s3 }
  0x22   : > { %s184_s7 = scalar_lea.vmem (!%p175_p3), [#allocation2], %s409_s4 }
  0x23   : > { %609 = dma.done.wait (%p709_p8), %s181_s5, 128  }
  0x24   : > { %611 = vsyncadd (%p709_p8), %s181_s5, 4294967168  ;;  %s410_s25 = sshll.u32 %s748_s3, 1  ;;  %s191_s6 = scalar_lea.sflag [#allocation6], %s748_s3 }
  0x25   : > { %s758_s8 = scalar_lea.vmem [#allocation5], %s410_s25 }
  0x26   : > { %613 = dma.done.wait (%p709_p8), %s191_s6, 32  }
  0x27   : > { %615 = vsyncadd (%p709_p8), %s191_s6, 4294967264  ;;  %s765_s15 = scalar_lea.vmem [#allocation7], %s748_s3  ;;  %v646_v0 = vmov 0.0   ;;  %vm225_vm0 = vcmask 1041408   ;;  %v220_v1 = vld [vmem:[%s184_s7] sm:$0x3]  ;;  %s295_s18 = scalar_lea.hbm %s821_s2, %s634_s12 }
  0x28   : > { %282 = vst [vmem:[%s765_s15] sm:$0x1] %v646_v0  ;;  %v221_v2 = vld [vmem:[%s184_s7 + $0x2] sm:$0x3]  ;;  %v222_v3 = vld [vmem:[%s184_s7 + $0x4] sm:$0x3]  ;;  %v226_v5 = vsel %vm225_vm0, %v220_v1, -inf }
  0x29   : > { %v223_v4 = vld [vmem:[%s184_s7 + $0x6] sm:$0x3]  ;;  %v227_v6 = vsel %vm225_vm0, %v221_v2, -inf  ;;  %v228_v7 = vsel %vm225_vm0, %v222_v3, -inf  ;;  %v224_v24 = vld [vmem:[%s758_s8] sm:$0x3] }
  0x2a   : > { %v229_v8 = vsel %vm225_vm0, %v223_v4, -inf  ;;  %v230_v9 = vmax.f32 %v226_v5, %v227_v6  ;;  %vm252_vm1 = vcmp.eq.s32.totalorder %v224_v24, 0  ;;  %vm254_vm2 = vcmp.eq.s32.totalorder %v224_v24, 1  ;;  %s297_s20 = sshll.u32 %s765_s15, 4  ;;  %s299_s26 = sshll.u32 %s295_s18, 4  ;;  %s298_s20 = int_to_ptr.vmem [resolvable:$true] %s297_s20  ;;  %s300_s26 = int_to_ptr.hbm [resolvable:$true] %s299_s26 }
  0x2b   : > { %v231_v10 = vmax.f32 %v228_v7, %v229_v8  ;;  %v253_v32 = vsel %vm252_vm1, %v220_v1, 0.0  ;;  %vm256_vm3 = vcmp.eq.s32.totalorder %v224_v24, 2  ;;  %vm258_vm4 = vcmp.eq.s32.totalorder %v224_v24, 3  ;;  %s287_s19 = scalar_lea.sflag [#allocation4], %s748_s3  ;;  %s570_s27 = sshra.s32 %s300_s26, 4  ;;  %s571_s27 = int_to_ptr.hbm [resolvable:$true] %s570_s27 }
  0x2c   : > { %v255_v33 = vsel %vm254_vm2, %v221_v2, %v253_v32  ;;  %s572_s28 = scalar_lea.hbm %s571_s27, 1  ;;  %s576_s12 = scalar_lea.hbm %s821_s2, 2 }
  0x2d   : > { %v232_v11 = vmax.f32 %v230_v9, %v231_v10  ;;  %v257_v34 = vsel %vm256_vm3, %v222_v3, %v255_v33  ;;  %p573_p4 = scmp.ne.s32.totalorder %s571_s27, %s572_s28  ;;  %p577_p7 = scmp.lt.s32.totalorder %s571_s27, %s821_s2 }
  0x2e   : > { %v259_v37 = vsel %vm258_vm4, %v223_v4, %v257_v34  ;;  %p578_p8 = scmp.lt.s32.totalorder %s576_s12, %s572_s28 }
  0x2f   : > { %v233_v12 = vsub.f32 %v220_v1, %v232_v11  ;;  %v234_v13 = vsub.f32 %v221_v2, %v232_v11  ;;  %v235_v14 = vsub.f32 %v222_v3, %v232_v11  ;;  %v236_v15 = vsub.f32 %v223_v4, %v232_v11  ;;  %v283_v53 = vld [vmem:[%s765_s15] sm:$0x1]  ;;  %p574_p5 = pnand %p573_p4, %p713_p9 }
  0x30   : > { %p579_p10 = por %p578_p8, %p577_p7 }
  0x31   : > { %v237_v16 = vmul.f32 1.442695, %v233_v12  ;;  %v239_v17 = vmul.f32 1.442695, %v234_v13  ;;  %v241_v18 = vmul.f32 1.442695, %v235_v14  ;;  %p575_p6 = pneg %p574_p5 }
  0x32   : > { %v243_v19 = vmul.f32 1.442695, %v236_v15 }
  0x33   : > { %484 = vpow2.f32 %v237_v16  ;;  %p580_p13 = pnand %p579_p10, %p575_p6 }
  0x34   : > { %486 = vpow2.f32 %v239_v17 }
  0x35   : > { %488 = vpow2.f32 %v241_v18 }
  0x36   : > { %490 = vpow2.f32 %v243_v19 }
  0x39   : > { %v485_v20 = vpop.eup %484 }
  0x3a   : > { %v487_v21 = vpop.eup %486  ;;  %v245_v22 = vsel %vm225_vm0, %v485_v20, 0.0 }
  0x3b   : > { %v489_v23 = vpop.eup %488  ;;  %v246_v25 = vsel %vm225_vm0, %v487_v21, 0.0 }
  0x3c   : > { %v491_v26 = vpop.eup %490  ;;  %v247_v27 = vadd.f32 %v246_v25, %v245_v22  ;;  %v248_v28 = vsel %vm225_vm0, %v489_v23, 0.0 }
  0x3d   : > { %v250_v29 = vsel %vm225_vm0, %v491_v26, 0.0 }
  0x3e   : > { %v249_v30 = vadd.f32 %v248_v28, %v247_v27 }
  0x40   : > { %v251_v31 = vadd.f32 %v250_v29, %v249_v30 }
  0x42   : > { %492 = vlog2.f32 %v251_v31 }
  0x48   : > { %v493_v35 = vpop.eup %492 }
  0x49   : > { %v261_v36 = vmul.f32 0.6931472, %v493_v35 }
  0x4b   : > { %v262_v38 = vadd.f32 %v261_v36, %v232_v11 }
  0x4d   : > { %v263_v39 = vsub.f32 %v262_v38, %v259_v37 }
  0x4f   : > { %v264_v40 = vsub.f32 0.0, %v263_v39 }
  0x51   : > { %v265_v41 = vmul.f32 1.442695, %v264_v40 }
  0x53   : > { %494 = vpow2.f32 %v265_v41 }
  0x59   : > { %v495_v42 = vpop.eup %494 }
  0x5a   : > { %v267_v43 = vsub.f32 1.0, %v495_v42 }
  0x5c   : > { %v268_v44 = vmax.f32 %v267_v43, 0.0 }
  0x5e   : > { %v269_v45 = vmul.f32 %v268_v44, %v268_v44 }
  0x60   : > { %v270_v46 = vmul.f32 %v269_v45, %v263_v39 }
  0x62   : > { %v271_v47 = vsel %vm225_vm0, %v270_v46, 0.0 }
  0x63   : > { %v272_v48 = vrot.slane %v271_v47, 4 }
  0x65   : > { %v273_v49 = vadd.f32 %v272_v48, %v271_v47 }
  0x67   : > { %v274_v50 = vrot.slane %v273_v49, 2 }
  0x69   : > { %v275_v51 = vadd.f32 %v274_v50, %v273_v49 }
  0x6b   : > { %v276_v52 = vrot.slane %v275_v51, 1 }
  0x6d   : > { %v277_v54 = vadd.f32 %v276_v52, %v275_v51 }
  0x6f   : > { %v284_v55 = vadd.f32 %v283_v53, %v277_v54 }
  0x71   : > { %285 = vst [vmem:[%s765_s15] sm:$0x1] %v284_v55 }
  0x72   : > { %583 = shalt.err (!%p580_p13)
}
  0x73   : > { %418 = dma.vmem_to_hbm [thread:$0]  (%p713_p9), %s298_s20, 16, %s300_s26, %s287_s19  }
  0x74 PF: > { %s311_s3 = sand.u32 1, %s622_s9   ;;  %p428_p0 = pnand %p402_p12, %p720_p11 }
  0x75   : > { %s312_s7 = scalar_lea.sflag [#allocation4], %s311_s3 }
  0x76   : > { %p429_p1 = pneg %p428_p0 }
  0x78   : > { %617 = dma.done.wait (%p429_p1), %s312_s7, 16  }
  0x79   : > { %619 = vsyncadd (%p429_p1), %s312_s7, 4294967280  ;;  %s21_s14 = sadd.s32 1, %s642_s14   ;;  %s827_s9 = smov %s626_s10 }
  0x7a   : > { %p18_p2 = scmp.ge.s32.totalorder %s21_s14, 4   ;;  %s828_s10 = smov %s630_s11 }
  0x7b   : > { %s829_s11 = smov %s718_s23  ;;  %s830_s12 = smov %s638_s13 }
  0x7c   : > { %s831_s13 = smov %s833_s17  ;;  %20 = sbr.rel (!%p18_p2) target bundleno = 8 (0x8), region = 90 }
  0x81   :  { %317 = vsyncpa [#allocation3], 1 }
  0x82   :  { %319 = vsyncpa [#allocation3 + $0x1], 1 }
  0x83   :  { %320 = vsyncpa [#allocation6], 1 }
  0x84   :  { %322 = vsyncpa [#allocation6 + $0x1], 1 }
  0x85   :  { %323 = vsyncpa [#allocation4], 1 }
  0x86   :  { %325 = vsyncpa [#allocation4 + $0x1], 1 }

</bundles_post_ra>
